<compile_context>
chip_gen: v6e
topology: v6e:2x2x1
jax: 0.10.0
libtpu: 0.0.40
codegen_flags: <defaults>
</compile_context>

<pallas_src>
import jax
import jax.numpy as jnp
from jax.experimental import pallas as pl
from jax.experimental.pallas import tpu as pltpu

_MiB = 1024 * 1024
# Sanity ceiling on rows per block (far above the ~512-row efficiency knee): keeps
# block shapes reasonable for the compiler when d is very narrow.
_MAX_TILE_ROWS = 128 * 1024


def _round_up(a: int, b: int) -> int:
    return -(-a // b) * b


def _vmem_plan():
    """Returns (stream_budget_bytes, vmem_limit_bytes, assume_two_tensorcores)."""
    try:
        cap = int(pltpu.get_tpu_info().vmem_capacity_bytes)
    except Exception:
        cap = 64 * _MiB  # unknown -> assume the smallest (v7x-like) configuration
    if cap >= 96 * _MiB:
        # v5e / v6e class: 128 MiB physical VMEM, single TensorCore.
        return 96 * _MiB, 112 * _MiB, False
    # v7x class: 64 MiB per TC, two TCs share the grid.
    return 36 * _MiB, 50 * _MiB, True


def _per_row_vmem_bytes(d: int, itemsize: int, lane_dense: bool) -> int:
    """VMEM bytes consumed per x row, counting every buffered/temp consumer."""
    per_row = 2 * d * itemsize            # double-buffered x stream (the HBM traffic)
    per_row += d * 4                      # f32 product temp of x * theta
    if itemsize < 4:
        per_row += d * 4                  # f32 upcast copy of a bf16/fp8 x block
    # Double-buffered output block: lane-dense (1, tile_n) pads to 8 sublanes
    # (32 B/row/buffer); the (tile_n, 1) column layout pads the lane dim 1->128
    # (512 B/row/buffer).
    per_row += (2 * 8 * 4) if lane_dense else (2 * 128 * 4)
    return per_row


def _const_vmem_bytes(d: int) -> int:
    # theta row + its f32 upcast, plus slack for compiler-internal scratch.
    return 2 * d * 4 + 256 * 1024


# --------------------------------------------------------------------------- kernels


def _logreg_kernel_lane_dense(x_ref, theta_ref, o_ref):
    # theta is resident as a [1, d] lane-major row: VPU broadcast-multiply + lane
    # reduction replaces a 1-column MXU matmul.  All compute sits in slots that are
    # free while the HBM->VMEM x stream (the real bottleneck) is in flight.
    x = x_ref[...].astype(jnp.float32)
    t = theta_ref[...].astype(jnp.float32)
    z = jnp.sum(x * t, axis=-1)                           # [tile_n], f32 accumulate
    # sigmoid(z) = 1/(1+exp(-z)); exp on the EUP.  Exact reciprocal keeps outputs
    # within 1e-5 of the f32 reference (switch to approx=True if tolerance allows).
    p = pl.reciprocal(1.0 + jnp.exp(-z), approx=False)
    # One sublane->lane relayout: store the per-row results as a lane-major row block.
    o_ref[...] = p.reshape(o_ref.shape).astype(o_ref.dtype)


def _logreg_kernel_column(x_ref, theta_ref, o_ref):
    # Fallback layout: (tile_n, 1) column output (lane-padded in VMEM, masked stores).
    x = x_ref[...].astype(jnp.float32)
    t = theta_ref[...].astype(jnp.float32)
    z = jnp.sum(x * t, axis=-1, keepdims=True)            # [tile_n, 1]
    o_ref[...] = pl.reciprocal(1.0 + jnp.exp(-z), approx=False).astype(o_ref.dtype)


# ---------------------------------------------------------------------- pallas calls


def _pallas_lane_dense(x, theta_row, tile_n: int, vmem_limit: int):
    n, d = x.shape
    num_tiles = pl.cdiv(n, tile_n)
    out = pl.pallas_call(
        _logreg_kernel_lane_dense,
        out_shape=jax.ShapeDtypeStruct((1, num_tiles * tile_n), x.dtype),
        grid_spec=pltpu.PrefetchScalarGridSpec(
            num_scalar_prefetch=0,
            grid=(num_tiles,),
            in_specs=[
                pl.BlockSpec((tile_n, d), lambda i: (i, 0)),   # streamed row tiles
                pl.BlockSpec((1, d), lambda i: (0, 0)),        # theta, DMA'd once
            ],
            out_specs=pl.BlockSpec((1, tile_n), lambda i: (0, i)),  # lane-dense rows
        ),
        compiler_params=pltpu.CompilerParams(
            dimension_semantics=("parallel",),                 # megacore-shardable
            vmem_limit_bytes=vmem_limit,
        ),
    )(x, theta_row)
    # Padded tail rows (if any) are garbage computed from padded reads; slice them off.
    return out[0, :n].reshape(n, 1)


def _pallas_column(x, theta_row, tile_n: int, vmem_limit: int):
    n, d = x.shape
    num_tiles = pl.cdiv(n, tile_n)
    return pl.pallas_call(
        _logreg_kernel_column,
        out_shape=jax.ShapeDtypeStruct((n, 1), x.dtype),
        grid_spec=pltpu.PrefetchScalarGridSpec(
            num_scalar_prefetch=0,
            grid=(num_tiles,),
            in_specs=[
                pl.BlockSpec((tile_n, d), lambda i: (i, 0)),
                pl.BlockSpec((1, d), lambda i: (0, 0)),
            ],
            out_specs=pl.BlockSpec((tile_n, 1), lambda i: (i, 0)),
        ),
        compiler_params=pltpu.CompilerParams(
            dimension_semantics=("parallel",),
            vmem_limit_bytes=vmem_limit,
        ),
    )(x, theta_row)


# ------------------------------------------------------------------- lane-dense probe

_LANE_DENSE_OK = None


def _lane_dense_supported() -> bool:
    """One-time probe: does the sublane->lane relayout of the reduction result both
    lower and produce correctly ordered output on this Mosaic version?  If not, fall
    back to the (tile_n, 1) column layout, which is known-good."""
    global _LANE_DENSE_OK
    if _LANE_DENSE_OK is None:
        try:
            n, d, tile = 384, 128, 128     # 3 blocks -> exercises multi-tile ordering
            xs = (jnp.arange(n * d, dtype=jnp.float32).reshape(n, d) % 7.0) * 0.1 - 0.3
            th = (jnp.arange(d, dtype=jnp.float32).reshape(1, d) % 5.0) * 0.05 - 0.1
            got = _pallas_lane_dense(xs, th, tile, 48 * _MiB)
            want = jax.nn.sigmoid(xs @ th.reshape(d, 1))
            _LANE_DENSE_OK = bool(jnp.allclose(got, want, atol=1e-5, rtol=1e-5))
        except Exception:
            _LANE_DENSE_OK = False
    return _LANE_DENSE_OK


# --------------------------------------------------------------------------- wrapper


def logistic_regression(
    x: jax.Array,
    theta: jax.Array,
    *,
    min_rows_for_pallas: int = 4096,
    tile_n=None,
) -> jax.Array:
    """sigmoid(einsum('ij,jk->ik', x, theta)); x:[n,d], theta:[d,1] -> [n,1]."""
    n, d = x.shape
    assert theta.shape == (d, 1)

    # Tiny problems: launch + DMA setup dominates -> let XLA fuse matvec + sigmoid.
    if n < min_rows_for_pallas:
        return logistic_regression_ref(x, theta)

    budget, vmem_limit, two_tc = _vmem_plan()
    lane_dense = _lane_dense_supported()
    gran = 128 if lane_dense else 8

    itemsize = x.dtype.itemsize
    per_row = _per_row_vmem_bytes(d, itemsize, lane_dense)
    const = _const_vmem_bytes(d)

    # Pathologically wide d: even a minimal row block overflows the budget.
    # TODO(synk): add a K grid axis with an f32 VMEM accumulator (pl.when init /
    # finalize) for very wide d instead of falling back to XLA.
    if const + per_row * gran > budget:
        return logistic_regression_ref(x, theta)

    if tile_n is None:
        tile_n = (budget - const) // per_row
        tile_n = min(tile_n, _MAX_TILE_ROWS)
        if two_tc:
            # Keep >= ~4 blocks so the 'parallel' row axis load-balances across 2 TCs.
            tile_n = min(tile_n, max(gran, _round_up(-(-n // 4), gran)))
        tile_n = (tile_n // gran) * gran          # round down: stay inside the budget
    else:
        tile_n = _round_up(int(tile_n), gran)     # honor request, meet layout granularity
    tile_n = max(gran, min(tile_n, _round_up(n, gran)))

    # TODO(synk): for d < 128 (partial lane use), zero-pad the feature dim to 128
    # upstream (pad theta too) when the copy can be amortized across many calls.

    theta_row = theta.reshape(1, d)               # lane-major, resident across the grid
    if lane_dense:
        return _pallas_lane_dense(x, theta_row, tile_n, vmem_limit)
    return _pallas_column(x, theta_row, tile_n, vmem_limit)


def logistic_regression_ref(x: jax.Array, theta: jax.Array) -> jax.Array:
    return jax.nn.sigmoid(jnp.einsum("ij,jk->ik", x, theta))


if __name__ == "__main__":
    key = jax.random.PRNGKey(0)
    k_x, k_theta, k_x2 = jax.random.split(key, 3)

    # Small shapes consistent with the module's forward: x:[n,d], theta:[d,1].
    n, dim = 8, 32
    x = jax.random.normal(k_x, (n, dim), dtype=jnp.float32)
    theta = jax.random.normal(k_theta, (dim, 1), dtype=jnp.float32)  # ~ randn(dim, 1)

    # Force the Pallas path (production default routes tiny shapes to XLA).
    out = logistic_regression(x, theta, min_rows_for_pallas=0)
    jax.block_until_ready(out)
    ref = logistic_regression_ref(x, theta)
    assert out.shape == (n, 1)
    assert jnp.allclose(out, ref, atol=1e-5, rtol=1e-5)

    # Multi-tile grid + partial final block + resident theta across grid steps.
    n2 = 300
    x2 = jax.random.normal(k_x2, (n2, dim), dtype=jnp.float32)
    out2 = logistic_regression(x2, theta, min_rows_for_pallas=0, tile_n=128)
    jax.block_until_ready(out2)
    ref2 = logistic_regression_ref(x2, theta)
    assert out2.shape == (n2, 1)
    assert jnp.allclose(out2, ref2, atol=1e-5, rtol=1e-5)

    print("KERNEL_OK")
</pallas_src>

<mosaic_0001>
module attributes {stable_mosaic.version = 11 : i64} {
  func.func @_logreg_kernel_lane_dense(%arg0: i32, %arg1: memref<128x128xf32, #tpu.memory_space<vmem>>, %arg2: memref<1x128xf32, #tpu.memory_space<vmem>>, %arg3: memref<1x128xf32, #tpu.memory_space<vmem>>) attributes {dimension_semantics = [#tpu.dimension_semantics<parallel>], iteration_bounds = array<i64: 3>, scalar_prefetch = 0 : i64, scratch_operands = 0 : i64, tpu.core_type = #tpu.core_type<tc>, window_params = [{transform_indices = @transform_0, window_bounds = array<i64: 128, 128>}, {pipeline_mode = #tpu.pipeline_mode<synchronous>, transform_indices = @transform_1, window_bounds = array<i64: 1, 128>}, {transform_indices = @transform_2, window_bounds = array<i64: 1, 128>}]} {
    %c0 = arith.constant 0 : index
    %c0_0 = arith.constant 0 : index
    %0 = vector.load %arg1[%c0, %c0_0] : memref<128x128xf32, #tpu.memory_space<vmem>>, vector<128x128xf32>
    %c0_1 = arith.constant 0 : index
    %c0_2 = arith.constant 0 : index
    %1 = vector.load %arg2[%c0_1, %c0_2] : memref<1x128xf32, #tpu.memory_space<vmem>>, vector<1x128xf32>
    %2 = vector.broadcast %1 : vector<1x128xf32> to vector<128x128xf32>
    %3 = arith.mulf %0, %2 : vector<128x128xf32>
    %cst = arith.constant dense<0.000000e+00> : vector<128xf32>
    %4 = vector.multi_reduction <add>, %3, %cst [1] : vector<128x128xf32> to vector<128xf32>
    %cst_3 = arith.constant 0.000000e+00 : f32
    %5 = vector.broadcast %cst_3 : f32 to vector<128xf32>
    %6 = arith.subf %5, %4 : vector<128xf32>
    %7 = math.exp %6 : vector<128xf32>
    %cst_4 = arith.constant 1.000000e+00 : f32
    %8 = vector.broadcast %cst_4 : f32 to vector<128xf32>
    %9 = arith.addf %8, %7 : vector<128xf32>
    %10 = tpu.reciprocal %9 : vector<128xf32> -> vector<128xf32>
    %11 = vector.shape_cast %10 : vector<128xf32> to vector<1x128xf32>
    %c0_5 = arith.constant 0 : index
    %c0_6 = arith.constant 0 : index
    %12 = vector.load %arg3[%c0_5, %c0_6] : memref<1x128xf32, #tpu.memory_space<vmem>>, vector<1x128xf32>
    tpu.vector_store %arg3[%c0_5, %c0_6], %11 {strides = array<i32>} : memref<1x128xf32, #tpu.memory_space<vmem>>, vector<1x128xf32>,
    return
  }
  func.func @transform_0(%arg0: i32) -> (i32, i32) {
    %c0_i32 = arith.constant 0 : i32
    %c0_i32_0 = arith.constant 0 : i32
    return %arg0, %c0_i32 : i32, i32
  }
  func.func @transform_1(%arg0: i32) -> (i32, i32) {
    %c0_i32 = arith.constant 0 : i32
    %c0_i32_0 = arith.constant 0 : i32
    %c0_i32_1 = arith.constant 0 : i32
    return %c0_i32, %c0_i32_0 : i32, i32
  }
  func.func @transform_2(%arg0: i32) -> (i32, i32) {
    %c0_i32 = arith.constant 0 : i32
    %c0_i32_0 = arith.constant 0 : i32
    return %c0_i32, %arg0 : i32, i32
  }
}

module attributes {stable_mosaic.version = 11 : i64} {
  func.func @_logreg_kernel_column(%arg0: i32, %arg1: memref<8x32xf32, #tpu.memory_space<vmem>>, %arg2: memref<1x32xf32, #tpu.memory_space<vmem>>, %arg3: memref<8x1xf32, #tpu.memory_space<vmem>>) attributes {dimension_semantics = [#tpu.dimension_semantics<parallel>], iteration_bounds = array<i64: 1>, scalar_prefetch = 0 : i64, scratch_operands = 0 : i64, tpu.core_type = #tpu.core_type<tc>, window_params = [{transform_indices = @transform_0, window_bounds = array<i64: 8, 32>}, {pipeline_mode = #tpu.pipeline_mode<synchronous>, transform_indices = @transform_1, window_bounds = array<i64: 1, 32>}, {transform_indices = @transform_2, window_bounds = array<i64: 8, 1>}]} {
    %c0 = arith.constant 0 : index
    %c0_0 = arith.constant 0 : index
    %0 = vector.load %arg1[%c0, %c0_0] : memref<8x32xf32, #tpu.memory_space<vmem>>, vector<8x32xf32>
    %c0_1 = arith.constant 0 : index
    %c0_2 = arith.constant 0 : index
    %1 = vector.load %arg2[%c0_1, %c0_2] : memref<1x32xf32, #tpu.memory_space<vmem>>, vector<1x32xf32>
    %2 = vector.broadcast %1 : vector<1x32xf32> to vector<8x32xf32>
    %3 = arith.mulf %0, %2 : vector<8x32xf32>
    %cst = arith.constant dense<0.000000e+00> : vector<8xf32>
    %4 = vector.multi_reduction <add>, %3, %cst [1] : vector<8x32xf32> to vector<8xf32>
    %5 = vector.shape_cast %4 : vector<8xf32> to vector<8x1xf32>
    %cst_3 = arith.constant 0.000000e+00 : f32
    %6 = vector.broadcast %cst_3 : f32 to vector<8x1xf32>
    %7 = arith.subf %6, %5 : vector<8x1xf32>
    %8 = math.exp %7 : vector<8x1xf32>
    %cst_4 = arith.constant 1.000000e+00 : f32
    %9 = vector.broadcast %cst_4 : f32 to vector<8x1xf32>
    %10 = arith.addf %9, %8 : vector<8x1xf32>
    %11 = tpu.reciprocal %10 : vector<8x1xf32> -> vector<8x1xf32>
    %c0_5 = arith.constant 0 : index
    %c0_6 = arith.constant 0 : index
    %12 = vector.load %arg3[%c0_5, %c0_6] : memref<8x1xf32, #tpu.memory_space<vmem>>, vector<8x1xf32>
    tpu.vector_store %arg3[%c0_5, %c0_6], %11 {strides = array<i32>} : memref<8x1xf32, #tpu.memory_space<vmem>>, vector<8x1xf32>,
    return
  }
  func.func @transform_0(%arg0: i32) -> (i32, i32) {
    %c0_i32 = arith.constant 0 : i32
    %c0_i32_0 = arith.constant 0 : i32
    return %arg0, %c0_i32 : i32, i32
  }
  func.func @transform_1(%arg0: i32) -> (i32, i32) {
    %c0_i32 = arith.constant 0 : i32
    %c0_i32_0 = arith.constant 0 : i32
    %c0_i32_1 = arith.constant 0 : i32
    return %c0_i32, %c0_i32_0 : i32, i32
  }
  func.func @transform_2(%arg0: i32) -> (i32, i32) {
    %c0_i32 = arith.constant 0 : i32
    %c0_i32_0 = arith.constant 0 : i32
    return %arg0, %c0_i32 : i32, i32
  }
}

</mosaic_0001>

<bundles_post_ra>
// kernel: tpu_custom_call.1
= control target key start
LH: loop header
LB: loop body
LE: loop exit
PB: predicated region body
PF: predicated region fallthrough
CT: control target
= control target key end

     0   :  { %7 = vsyncpa [#allocation3], 0  ;;  %s963_s0 = inlined_call_operand.hbm [shape: f32[384,128], index: 0, kind: input, shape index: {}]   ;;  %s964_s1 = inlined_call_operand.vmem [shape: f32[1,128], index: 1, kind: input, shape index: {}]   ;;  %s965_s2 = inlined_call_operand.hbm [shape: f32[1,384], index: 2, kind: output, shape index: {}]  }
   0x1   :  { %9 = vsyncpa [#allocation3 + $0x1], 0 }
   0x2   :  { %10 = vsyncpa [#allocation4], 0 }
   0x3   :  { %12 = vsyncpa [#allocation4 + $0x1], 0  ;;  %s759_s9 = smov 0   ;;  %s761_s10 = smov 0  }
   0x4   :  { %s763_s11 = smov 0   ;;  %s765_s12 = smov 0  }
   0x5 LB: > { %s780_s13 = sadd.s32 4294967295, %s738_s12   ;;  %s521_s14 = sadd.s32 4294967294, %s738_s12   ;;  %s738_s12 = sphi %s765_s12, %s979_s12   ;;  %s734_s11 = sphi %s763_s11, %s978_s11   ;;  %s730_s10 = sphi %s761_s10, %s977_s10   ;;  %s726_s9 = sphi %s759_s9, %s976_s9  }
   0x6   : > { %s784_s15 = sadd.s32 1, %s738_s12   ;;  %s25_s16 = sadd.s32 1, %s734_s11 }
   0x7   : > { %s22_s17 = ssub.s32 %s738_s12, %s784_s15  ;;  %p32_p0 = scmp.ne.s32.totalorder %s734_s11, %s730_s10 }
   0x8   : > { %p23_p1 = scmp.eq.s32.totalorder %s22_s17, 0  ;;  %p33_p2 = scmp.eq.s32.totalorder %s738_s12, 0 }
   0x9   : > { %p38_p3 = scmp.ne.s32.totalorder %s730_s10, %s726_s9  ;;  %p39_p4 = scmp.eq.s32.totalorder %s780_s13, 0 }
   0xa   : > { %s796_s18 = scalar_select %p23_p1, %s734_s11, %s25_s16  }
   0xb   : > { %p798_p5 = por %p33_p2, %p32_p0  ;;  %p802_p6 = por %p39_p4, %p38_p3 }
   0xc   : > { %p83_p7 = scmp.eq.s32.totalorder %s780_s13, 2  ;;  %p89_p8 = scmp.eq.s32.totalorder %s521_s14, 2 }
   0xd   : > { %s969_s20 = scalar_select %p802_p6, 1, 0 }
   0xe   : > { %p546_p9 = scmp.lt.s32.totalorder %s738_s12, 3  ;;  %p808_p10 = por %p83_p7, %p32_p0 }
   0xf   : > { %p812_p11 = por %p89_p8, %p38_p3  ;;  %s112_s23 = sand.u32 1, %s734_s11  }
  0x10   : > { %s970_s21 = scalar_select %p808_p10, 1, 0 }
  0x11   : > { %s971_s22 = scalar_select %p812_p11, 1, 0 }
  0x12   : > { %s533_s24 = sshll.u32 %s738_s12, 11  ;;  %s524_s25 = sshll.u32 %s112_s23, 7 }
  0x13   : > { %s821_s28 = scalar_lea.hbm %s963_s0, %s533_s24  ;;  %s116_s29 = scalar_lea.vmem [#allocation2], %s524_s25 }
  0x14   : > { %s123_s30 = sshll.u32 %s116_s29, 4  ;;  %p825_p12 = pnand %p546_p9, %p798_p5  ;;  %s829_s30 = int_to_ptr.vmem [resolvable:$true] %s123_s30 }
  0x15   : > { %s831_s4 = scalar_lea.sflag [#allocation3], %s112_s23  ;;  %s646_s5 = scalar_lea.hbm %s821_s28, 2048 }
  0x16   : > { %p647_p13 = scmp.ne.s32.totalorder %s821_s28, %s646_s5  ;;  %p648_p0 = pneg %p825_p12 }
  0x17   : > { %s651_s8 = scalar_lea.hbm %s963_s0, 6144  ;;  %p652_p3 = scmp.lt.s32.totalorder %s821_s28, %s963_s0 }
  0x18   : > { %p649_p1 = pnand %p648_p0, %p647_p13  ;;  %p653_p4 = scmp.lt.s32.totalorder %s651_s8, %s646_s5 }
  0x1a   : > { %p650_p2 = pneg %p649_p1  ;;  %p654_p5 = por %p653_p4, %p652_p3 }
  0x1c   : > { %p655_p7 = pnand %p654_p5, %p650_p2 }
  0x1e   : > { %658 = shalt.err (!%p655_p7)
}
  0x1f   : > { %s659_s17 = scalar_lea.vmem %s829_s30, 2048  ;;  %s740_s19 = smov [#allocation2]  }
  0x20   : > { %p660_p8 = scmp.ne.s32.totalorder %s829_s30, %s659_s17  ;;  %s664_s23 = sshll.u32 %s740_s19, 4  ;;  %s665_s23 = int_to_ptr.vmem [resolvable:$false] %s664_s23 }
  0x21   : > { %s666_s24 = scalar_lea.vmem %s665_s23, 4096  ;;  %p667_p1 = scmp.lt.s32.totalorder %s829_s30, %s665_s23 }
  0x22   : > { %p662_p9 = pnand %p660_p8, %p648_p0  ;;  %p668_p11 = scmp.lt.s32.totalorder %s666_s24, %s659_s17 }
  0x24   : > { %p663_p13 = pneg %p662_p9  ;;  %p669_p10 = por %p668_p11, %p667_p1 }
  0x26   : > { %p670_p6 = pnand %p669_p10, %p663_p13 }
  0x28   : > { %673 = shalt.err (!%p670_p6)
}
  0x29   : > { %s741_s25 = smov 128   ;;  %s742_s26 = smov 8  }
  0x2a   : > { %541 = dma.hbm_to_vmem [thread:$0]  (!%p825_p12), %s821_s28, 2048, %s829_s30, %s831_s4, %s741_s25, %s741_s25, %s742_s26  }
  0x2b   : > { %p527_p0 = scmp.ge.s32.totalorder %s738_s12, 1  ;;  %p131_p2 = scmp.lt.s32.totalorder %s738_s12, 4 }
  0x2d   : > { %p132_p3 = pnand %p527_p0, %p131_p2 }
  0x2e   : > { %s855_s27 = sand.u32 (!%p132_p3), 1, %s730_s10   ;;  %p973_p6 = scmp.ne.s32.totalorder (!%p132_p3), %s969_s20, 0 }
  0x2f   : > { %135 = sbr.rel (%p132_p3) target bundleno = 276 (0x114), region = 28  ;;  %s528_s29 = sshll.u32 (!%p132_p3), %s855_s27, 7 }
  0x30   : > { %s138_s5 = scalar_lea.sflag (!%p132_p3), [#allocation3], %s855_s27  ;;  %s859_s6 = scalar_lea.vmem (!%p132_p3), [#allocation2], %s528_s29 }
  0x34   : > { %717 = dma.done.wait (%p973_p6), %s138_s5, 2048  }
  0x35   : > { %719 = vsyncadd (%p973_p6), %s138_s5, 4294965248  ;;  %v162_v0 = vld [vmem:[%s859_s6] sm:$0xff]  ;;  %v164_v2 = vld [vmem:[%s859_s6 + $0x10] sm:$0xff]  ;;  %vm340_vm0 = vcmask 130112   ;;  %vm347_vm1 = vcmask 195712   ;;  %vm354_vm2 = vcmask 261312  }
  0x36   : > { %v529_v1 = vld [vmem:[%s964_s1] ss:$0 sm:$0xff]  ;;  %v163_v5 = vld [vmem:[%s859_s6 + $0x8] sm:$0xff]  ;;  %v165_v6 = vld [vmem:[%s859_s6 + $0x18] sm:$0xff]  ;;  %vm361_vm3 = vcmask 326912   ;;  %vm368_vm4 = vcmask 392512  }
  0x37   : > { %v185_v3 = vmul.f32 %v529_v1, %v162_v0  ;;  %v187_v4 = vmul.f32 %v529_v1, %v164_v2  ;;  %v186_v7 = vmul.f32 %v529_v1, %v163_v5  ;;  %v188_v8 = vmul.f32 %v529_v1, %v165_v6  ;;  %v166_v9 = vld [vmem:[%s859_s6 + $0x20] sm:$0xff]  ;;  %v167_v10 = vld [vmem:[%s859_s6 + $0x28] sm:$0xff]  ;;  %v168_v13 = vld [vmem:[%s859_s6 + $0x30] sm:$0xff]  ;;  %s530_s20 = sshll.u32 %s780_s13, 4  ;;  %s160_s3 = scalar_lea.vmem [#allocation5], %s855_s27 }
  0x38   : > { %v189_v11 = vmul.f32 %v529_v1, %v166_v9  ;;  %v190_v12 = vmul.f32 %v529_v1, %v167_v10  ;;  %v169_v14 = vld [vmem:[%s859_s6 + $0x38] sm:$0xff]  ;;  %v191_v15 = vmul.f32 %v529_v1, %v168_v13  ;;  %v170_v17 = vld [vmem:[%s859_s6 + $0x40] sm:$0xff]  ;;  %v171_v18 = vld [vmem:[%s859_s6 + $0x48] sm:$0xff]  ;;  %vm375_vm5 = vcmask 458112   ;;  %s455_s4 = sshll.u32 %s160_s3, 4  ;;  %s927_s14 = scalar_lea.hbm %s965_s2, %s530_s20  ;;  %s456_s4 = int_to_ptr.vmem [resolvable:$true] %s455_s4 }
  0x39   : > { %201 = vadd.xlane.f32.xlu0 %v185_v3  ;;  %205 = vadd.xlane.f32.xlu1 %v187_v4  ;;  %v192_v16 = vmul.f32 %v529_v1, %v169_v14  ;;  %v193_v19 = vmul.f32 %v529_v1, %v170_v17  ;;  %v194_v20 = vmul.f32 %v529_v1, %v171_v18  ;;  %v172_v21 = vld [vmem:[%s859_s6 + $0x50] sm:$0xff]  ;;  %v173_v22 = vld [vmem:[%s859_s6 + $0x58] sm:$0xff]  ;;  %v174_v25 = vld [vmem:[%s859_s6 + $0x60] sm:$0xff]  ;;  %vm382_vm6 = vcmask 523712   ;;  %s443_s16 = scalar_lea.sflag [#allocation4], %s855_s27  ;;  %s674_s17 = scalar_lea.vmem %s456_s4, 16 }
  0x3a   : > { %v195_v23 = vmul.f32 %v529_v1, %v172_v21  ;;  %v196_v24 = vmul.f32 %v529_v1, %v173_v22  ;;  %v175_v26 = vld [vmem:[%s859_s6 + $0x68] sm:$0xff]  ;;  %v197_v27 = vmul.f32 %v529_v1, %v174_v25  ;;  %v176_v29 = vld [vmem:[%s859_s6 + $0x70] sm:$0xff]  ;;  %v177_v30 = vld [vmem:[%s859_s6 + $0x78] sm:$0xff]  ;;  %vm389_vm7 = vcmask 589312   ;;  %p675_p10 = scmp.ne.s32.totalorder %s456_s4, %s674_s17  ;;  %p974_p11 = scmp.ne.s32.totalorder %s970_s21, 0 }
  0x3b   : > { %v198_v28 = vmul.f32 %v529_v1, %v175_v26  ;;  %v199_v31 = vmul.f32 %v529_v1, %v176_v29  ;;  %v200_v32 = vmul.f32 %v529_v1, %v177_v30  ;;  %vm396_vm8 = vcmask 654912   ;;  %s743_s13 = smov [#allocation5]  }
  0x3c   : > { %vm403_vm9 = vcmask 720512   ;;  %vm410_vm10 = vcmask 786112   ;;  %vm417_vm11 = vcmask 851712   ;;  %vm424_vm12 = vcmask 917312   ;;  %p676_p12 = pnand %p675_p10, %p974_p11  ;;  %s678_s19 = sshll.u32 %s743_s13, 4  ;;  %s679_s19 = int_to_ptr.vmem [resolvable:$false] %s678_s19 }
  0x3d   : > { %203 = vadd.xlane.f32.xlu0 %v186_v7  ;;  %207 = vadd.xlane.f32.xlu1 %v188_v8  ;;  %v329_v8 = vlaneseq  ;;  %vm431_vm13 = vcmask 982912   ;;  %vm438_vm14 = vcmask 1048512   ;;  %s680_s23 = scalar_lea.vmem %s679_s19, 32  ;;  %p681_p5 = scmp.lt.s32.totalorder %s456_s4, %s679_s19 }
  0x3e   : > { %p677_p4 = pneg %p676_p12  ;;  %p682_p7 = scmp.lt.s32.totalorder %s680_s23, %s674_s17 }
  0x3f   : > { %v886_v30 = vshrl.u32 %v329_v8, 7 }
  0x40   : > { %p683_p8 = por %p682_p7, %p681_p5 }
  0x41   : > { %209 = vadd.xlane.f32.xlu0 %v189_v11  ;;  %211 = vadd.xlane.f32.xlu1 %v190_v12 }
  0x42   : > { %p684_p9 = pnand %p683_p8, %p677_p4 }
  0x45   : > { %213 = vadd.xlane.f32.xlu0 %v191_v15  ;;  %215 = vadd.xlane.f32.xlu1 %v192_v16 }
  0x49   : > { %217 = vadd.xlane.f32.xlu0 %v193_v19  ;;  %219 = vadd.xlane.f32.xlu1 %v194_v20  ;;  %v884_v19 = vand.u32 127, %v329_v8 }
  0x4d   : > { %221 = vadd.xlane.f32.xlu0 %v195_v23  ;;  %223 = vadd.xlane.f32.xlu1 %v196_v24 }
  0x51   : > { %225 = vadd.xlane.f32.xlu0 %v197_v27  ;;  %227 = vadd.xlane.f32.xlu1 %v198_v28 }
  0x55   : > { %229 = vadd.xlane.f32.xlu0 %v199_v31  ;;  %231 = vadd.xlane.f32.xlu1 %v200_v32  ;;  %v342_v31 = vadd.s32 4294967280, %v884_v19 }
  0xc2   : > { %v202_v33 = vpop.xlane.xlu0 %201  ;;  %v206_v34 = vpop.xlane.xlu1 %205 }
  0xc3   : > { %v233_v35 = vsub.f32 0.0, %v202_v33  ;;  %v235_v36 = vsub.f32 0.0, %v206_v34  ;;  %v335_v33 = vadd.s32 4294967288, %v884_v19 }
  0xc5   : > { %v249_v37 = vmul.f32 1.442695, %v233_v35  ;;  %v253_v38 = vmul.f32 1.442695, %v235_v36  ;;  %v349_v36 = vadd.s32 4294967272, %v884_v19 }
  0xc6   : > { %v204_v39 = vpop.xlane.xlu0 %203  ;;  %v208_v40 = vpop.xlane.xlu1 %207 }
  0xc7   : > { %582 = vpow2.f32 %v249_v37  ;;  %v234_v41 = vsub.f32 0.0, %v204_v39  ;;  %v236_v42 = vsub.f32 0.0, %v208_v40  ;;  %v356_v40 = vadd.s32 4294967264, %v884_v19 }
  0xc8   : > { %584 = vpow2.f32 %v253_v38 }
  0xc9   : > { %v251_v43 = vmul.f32 1.442695, %v234_v41  ;;  %v255_v44 = vmul.f32 1.442695, %v236_v42  ;;  %v333_v42 = vsub.s32 %v884_v19, %v886_v30 }
  0xca   : > { %v210_v45 = vpop.xlane.xlu0 %209  ;;  %v212_v46 = vpop.xlane.xlu1 %211 }
  0xcb   : > { %586 = vpow2.f32 %v251_v43  ;;  %v237_v47 = vsub.f32 0.0, %v210_v45  ;;  %v238_v48 = vsub.f32 0.0, %v212_v46  ;;  %v338_v43 = vsub.s32 %v335_v33, %v886_v30 }
  0xcc   : > { %588 = vpow2.f32 %v255_v44  ;;  %v345_v45 = vsub.s32 %v342_v31, %v886_v30  ;;  %v352_v46 = vsub.s32 %v349_v36, %v886_v30 }
  0xcd   : > { %v257_v49 = vmul.f32 1.442695, %v237_v47  ;;  %v259_v50 = vmul.f32 1.442695, %v238_v48 }
  0xce   : > { %v214_v51 = vpop.xlane.xlu0 %213  ;;  %v216_v52 = vpop.xlane.xlu1 %215 }
  0xcf   : > { %590 = vpow2.f32 %v257_v49  ;;  %v239_v53 = vsub.f32 0.0, %v214_v51  ;;  %v240_v54 = vsub.f32 0.0, %v216_v52  ;;  %v363_v51 = vadd.s32 4294967256, %v884_v19 }
  0xd0   : > { %592 = vpow2.f32 %v259_v50  ;;  %v359_v50 = vsub.s32 %v356_v40, %v886_v30 }
  0xd1   : > { %v261_v55 = vmul.f32 1.442695, %v239_v53  ;;  %v263_v56 = vmul.f32 1.442695, %v240_v54 }
  0xd2   : > { %v218_v57 = vpop.xlane.xlu0 %217  ;;  %v220_v58 = vpop.xlane.xlu1 %219 }
  0xd3   : > { %594 = vpow2.f32 %v261_v55  ;;  %v241_v59 = vsub.f32 0.0, %v218_v57  ;;  %v242_v60 = vsub.f32 0.0, %v220_v58 }
  0xd4   : > { %v583_v61 = vpop.eup %582  ;;  %596 = vpow2.f32 %v263_v56  ;;  %v370_v56 = vadd.s32 4294967248, %v884_v19 }
  0xd5   : > { %v585_v62 = vpop.eup %584  ;;  %v281_v63 = vadd.f32 1.0, %v583_v61  ;;  %v265_v0 = vmul.f32 1.442695, %v241_v59  ;;  %v267_v2 = vmul.f32 1.442695, %v242_v60 }
  0xd6   : > { %v283_v1 = vadd.f32 1.0, %v585_v62  ;;  %v222_v3 = vpop.xlane.xlu0 %221  ;;  %v224_v4 = vpop.xlane.xlu1 %223 }
  0xd7   : > { %598 = vrcp.f32 %v281_v63  ;;  %v243_v5 = vsub.f32 0.0, %v222_v3  ;;  %v244_v6 = vsub.f32 0.0, %v224_v4 }
  0xd8   : > { %v587_v7 = vpop.eup %586  ;;  %600 = vrcp.f32 %v283_v1  ;;  %v366_v1 = vsub.s32 %v363_v51, %v886_v30  ;;  %v433_v51 = vadd.s32 4294967176, %v884_v19 }
  0xd9   : > { %v589_v9 = vpop.eup %588  ;;  %v282_v10 = vadd.f32 1.0, %v587_v7  ;;  %602 = vpow2.f32 %v265_v0  ;;  %v269_v11 = vmul.f32 1.442695, %v243_v5  ;;  %v271_v13 = vmul.f32 1.442695, %v244_v6 }
  0xda   : > { %v284_v12 = vadd.f32 1.0, %v589_v9  ;;  %604 = vpow2.f32 %v267_v2  ;;  %v226_v14 = vpop.xlane.xlu0 %225  ;;  %v228_v15 = vpop.xlane.xlu1 %227  ;;  %v377_v2 = vadd.s32 4294967240, %v884_v19  ;;  %v373_v6 = vsub.s32 %v370_v56, %v886_v30 }
  0xdb   : > { %606 = vrcp.f32 %v282_v10  ;;  %v245_v16 = vsub.f32 0.0, %v226_v14  ;;  %v246_v17 = vsub.f32 0.0, %v228_v15  ;;  %v384_v10 = vadd.s32 4294967232, %v884_v19 }
  0xdc   : > { %v591_v18 = vpop.eup %590  ;;  %608 = vrcp.f32 %v284_v12  ;;  %v380_v15 = vsub.s32 %v377_v2, %v886_v30 }
  0xdd   : > { %v593_v20 = vpop.eup %592  ;;  %v285_v21 = vadd.f32 1.0, %v591_v18  ;;  %610 = vpow2.f32 %v269_v11  ;;  %v273_v22 = vmul.f32 1.442695, %v245_v16  ;;  %v275_v24 = vmul.f32 1.442695, %v246_v17 }
  0xde   : > { %v286_v23 = vadd.f32 1.0, %v593_v20  ;;  %612 = vpow2.f32 %v271_v13  ;;  %v230_v25 = vpop.xlane.xlu0 %229  ;;  %v232_v26 = vpop.xlane.xlu1 %231  ;;  %v391_v11 = vadd.s32 4294967224, %v884_v19 }
  0xdf   : > { %614 = vrcp.f32 %v285_v21  ;;  %v247_v27 = vsub.f32 0.0, %v230_v25  ;;  %v248_v28 = vsub.f32 0.0, %v232_v26  ;;  %v398_v25 = vadd.s32 4294967216, %v884_v19 }
  0xe0   : > { %v595_v29 = vpop.eup %594  ;;  %616 = vrcp.f32 %v286_v23  ;;  %v387_v23 = vsub.s32 %v384_v10, %v886_v30 }
  0xe1   : > { %v597_v32 = vpop.eup %596  ;;  %v287_v34 = vadd.f32 1.0, %v595_v29  ;;  %618 = vpow2.f32 %v273_v22  ;;  %v277_v35 = vmul.f32 1.442695, %v247_v27  ;;  %v279_v38 = vmul.f32 1.442695, %v248_v28 }
  0xe2   : > { %v288_v37 = vadd.f32 1.0, %v597_v32  ;;  %620 = vpow2.f32 %v275_v24  ;;  %v394_v24 = vsub.s32 %v391_v11, %v886_v30  ;;  %v405_v29 = vadd.s32 4294967208, %v884_v19 }
  0xe3   : > { %622 = vrcp.f32 %v287_v34  ;;  %v401_v36 = vsub.s32 %v398_v25, %v886_v30 }
  0xe4   : > { %v599_v39 = vpop.eup %598  ;;  %624 = vrcp.f32 %v288_v37  ;;  %v412_v37 = vadd.s32 4294967200, %v884_v19  ;;  %v408_v40 = vsub.s32 %v405_v29, %v886_v30 }
  0xe5   : > { %v601_v41 = vpop.eup %600  ;;  %626 = vpow2.f32 %v277_v35  ;;  %v334_v54 = vrot.slane %v599_v39, %v333_v42 }
  0xe6   : > { %v603_v44 = vpop.eup %602  ;;  %628 = vpow2.f32 %v279_v38  ;;  %v346_v58 = vrot.slane %v601_v41, %v345_v45  ;;  %v419_v41 = vadd.s32 4294967192, %v884_v19 }
  0xe7   : > { %v605_v47 = vpop.eup %604  ;;  %v289_v48 = vadd.f32 1.0, %v603_v44 }
  0xe8   : > { %v607_v49 = vpop.eup %606  ;;  %v290_v52 = vadd.f32 1.0, %v605_v47  ;;  %v426_v47 = vadd.s32 4294967184, %v884_v19 }
  0xe9   : > { %v609_v53 = vpop.eup %608  ;;  %v339_v55 = vrot.slane %v607_v49, %v338_v43  ;;  %630 = vrcp.f32 %v289_v48 }
  0xea   : > { %v611_v57 = vpop.eup %610  ;;  %v353_v59 = vrot.slane %v609_v53, %v352_v46  ;;  %632 = vrcp.f32 %v290_v52  ;;  %v415_v46 = vsub.s32 %v412_v37, %v886_v30  ;;  %v429_v56 = vsub.s32 %v426_v47, %v886_v30 }
  0xeb   : > { %v613_v60 = vpop.eup %612  ;;  %v341_v61 = vsel %vm340_vm0, %v339_v55, %v334_v54  ;;  %v291_v62 = vadd.f32 1.0, %v611_v57 }
  0xec   : > { %v615_v63 = vpop.eup %614  ;;  %v348_v0 = vsel %vm347_vm1, %v346_v58, %v341_v61  ;;  %v292_v3 = vadd.f32 1.0, %v613_v60 }
  0xed   : > { %v617_v4 = vpop.eup %616  ;;  %v360_v5 = vrot.slane %v615_v63, %v359_v50  ;;  %634 = vrcp.f32 %v291_v62  ;;  %v355_v8 = vsel %vm354_vm2, %v353_v59, %v348_v0  ;;  %v422_v50 = vsub.s32 %v419_v41, %v886_v30 }
  0xee   : > { %v619_v7 = vpop.eup %618  ;;  %636 = vrcp.f32 %v292_v3  ;;  %v367_v14 = vrot.slane %v617_v4, %v366_v1  ;;  %v436_v59 = vsub.s32 %v433_v51, %v886_v30 }
  0xef   : > { %v621_v9 = vpop.eup %620  ;;  %v293_v12 = vadd.f32 1.0, %v619_v7  ;;  %v362_v18 = vsel %vm361_vm3, %v360_v5, %v355_v8 }
  0xf0   : > { %v623_v13 = vpop.eup %622  ;;  %v294_v16 = vadd.f32 1.0, %v621_v9  ;;  %v369_v27 = vsel %vm368_vm4, %v367_v14, %v362_v18 }
  0xf1   : > { %v625_v17 = vpop.eup %624  ;;  %v374_v20 = vrot.slane %v623_v13, %v373_v6  ;;  %638 = vrcp.f32 %v293_v12 }
  0xf2   : > { %v627_v21 = vpop.eup %626  ;;  %640 = vrcp.f32 %v294_v16  ;;  %v381_v28 = vrot.slane %v625_v17, %v380_v15 }
  0xf3   : > { %v629_v22 = vpop.eup %628  ;;  %v295_v26 = vadd.f32 1.0, %v627_v21  ;;  %v376_v32 = vsel %vm375_vm5, %v374_v20, %v369_v27 }
  0xf4   : > { %v296_v31 = vadd.f32 1.0, %v629_v22  ;;  %v383_v38 = vsel %vm382_vm6, %v381_v28, %v376_v32 }
  0xf5   : > { %642 = vrcp.f32 %v295_v26 }
  0xf6   : > { %v631_v33 = vpop.eup %630  ;;  %644 = vrcp.f32 %v296_v31 }
  0xf7   : > { %v633_v34 = vpop.eup %632  ;;  %v388_v35 = vrot.slane %v631_v33, %v387_v23 }
  0xf8   : > { %v395_v39 = vrot.slane %v633_v34, %v394_v24 }
  0xf9   : > { %v390_v42 = vsel %vm389_vm7, %v388_v35, %v383_v38 }
  0xfa   : > { %v635_v43 = vpop.eup %634  ;;  %v397_v49 = vsel %vm396_vm8, %v395_v39, %v390_v42 }
  0xfb   : > { %v637_v44 = vpop.eup %636  ;;  %v402_v45 = vrot.slane %v635_v43, %v401_v36 }
  0xfc   : > { %v409_v48 = vrot.slane %v637_v44, %v408_v40 }
  0xfd   : > { %v404_v52 = vsel %vm403_vm9, %v402_v45, %v397_v49 }
  0xfe   : > { %v639_v53 = vpop.eup %638  ;;  %v411_v57 = vsel %vm410_vm10, %v409_v48, %v404_v52 }
  0xff   : > { %v641_v54 = vpop.eup %640  ;;  %v416_v55 = vrot.slane %v639_v53, %v415_v46 }
 0x100   : > { %v423_v58 = vrot.slane %v641_v54, %v422_v50 }
 0x101   : > { %v418_v60 = vsel %vm417_vm11, %v416_v55, %v411_v57 }
 0x102   : > { %v643_v61 = vpop.eup %642  ;;  %v425_v63 = vsel %vm424_vm12, %v423_v58, %v418_v60 }
 0x103   : > { %v645_v19 = vpop.eup %644  ;;  %v430_v62 = vrot.slane %v643_v61, %v429_v56 }
 0x104   : > { %v437_v0 = vrot.slane %v645_v19, %v436_v59 }
 0x105   : > { %v432_v1 = vsel %vm431_vm13, %v430_v62, %v425_v63 }
 0x106   : > { %v439_v30 = vsel %vm438_vm14, %v437_v0, %v432_v1 }
 0x107   : > { %441 = vst [vmem:[%s160_s3] sm:$0x1] %v439_v30 }
 0x108   : > { %687 = shalt.err (!%p684_p9)
}
 0x109   : > { %s688_s24 = scalar_lea.hbm %s927_s14, 16  ;;  %s692_s27 = scalar_lea.hbm %s965_s2, 48 }
 0x10a   : > { %p689_p13 = scmp.ne.s32.totalorder %s927_s14, %s688_s24  ;;  %p693_p2 = scmp.lt.s32.totalorder %s927_s14, %s965_s2 }
 0x10b   : > { %p694_p3 = scmp.lt.s32.totalorder %s692_s27, %s688_s24 }
 0x10c   : > { %p690_p1 = pnand %p689_p13, %p974_p11 }
 0x10d   : > { %p695_p6 = por %p694_p3, %p693_p2 }
 0x10e   : > { %p691_p0 = pneg %p690_p1 }
 0x110   : > { %p696_p10 = pnand %p695_p6, %p691_p0 }
 0x112   : > { %699 = shalt.err (!%p696_p10)
}
 0x113   : > { %536 = dma.vmem_to_hbm [thread:$0]  (%p974_p11), %s456_s4, 16, %s927_s14, %s443_s16  }
 0x114 PF: > { %p547_p12 = scmp.ge.s32.totalorder %s738_s12, 2  ;;  %s467_s6 = sand.u32 1, %s726_s9  }
 0x115   : > { %p975_p4 = scmp.ne.s32.totalorder %s971_s22, 0  ;;  %s468_s28 = scalar_lea.sflag [#allocation4], %s467_s6 }
 0x117   : > { %p543_p5 = pnand %p547_p12, %p975_p4 }
 0x119   : > { %p544_p7 = pneg %p543_p5 }
 0x11b   : > { %721 = dma.done.wait (%p544_p7), %s468_s28, 16  }
 0x11c   : > { %723 = vsyncadd (%p544_p7), %s468_s28, 4294967280  ;;  %p15_p8 = scmp.ge.s32.totalorder %s784_s15, 5   ;;  %s976_s9 = smov %s730_s10 }
 0x11d   : > { %s977_s10 = smov %s734_s11  ;;  %s978_s11 = smov %s796_s18 }
 0x11e   : > { %s979_s12 = smov %s784_s15  ;;  %17 = sbr.rel (!%p15_p8) target bundleno = 5 (0x5), region = 73 }
 0x123   :  { %472 = vsyncpa [#allocation3], 1 }
 0x124   :  { %474 = vsyncpa [#allocation3 + $0x1], 1 }
 0x125   :  { %475 = vsyncpa [#allocation4], 1 }
 0x126   :  { %477 = vsyncpa [#allocation4 + $0x1], 1 }

// kernel: tpu_custom_call.1
= control target key start
LH: loop header
LB: loop body
LE: loop exit
PB: predicated region body
PF: predicated region fallthrough
CT: control target
= control target key end

     0   :  { %7 = vsyncpa [#allocation3], 0  ;;  %s76_s9 = smov [#allocation2]   ;;  %s101_s0 = inlined_call_operand.hbm [shape: f32[8,32], index: 0, kind: input, shape index: {}]   ;;  %s102_s1 = inlined_call_operand.vmem [shape: f32[1,32], index: 1, kind: input, shape index: {}]   ;;  %s103_s2 = inlined_call_operand.vmem [shape: f32[8,1], index: 2, kind: output, shape index: {}]  }
   0x1   :  { %s14_s10 = sshll.u32 %s76_s9, 4  ;;  %s15_s10 = int_to_ptr.vmem [resolvable:$true] %s14_s10 }
   0x2   :  { %s62_s11 = scalar_lea.vmem %s15_s10, 128  ;;  %p67_p1 = scmp.lt.s32.totalorder %s15_s10, %s15_s10 }
   0x3   :  { %p63_p0 = scmp.ne.s32.totalorder %s15_s10, %s62_s11  ;;  %p68_p2 = scmp.lt.s32.totalorder %s62_s11, %s62_s11 }
   0x5   :  { %p69_p3 = por %p68_p2, %p67_p1 }
   0x7   :  { %p70_p4 = pnand %p69_p3, %p63_p0 }
   0x9   :  { %73 = shalt.err (!%p70_p4)
}
   0xa   :  { %17 = dma.hbm_to_vmem [thread:$0]  %s101_s0, 128, %s15_s10, [#allocation3]  }
   0xb   :  { %74 = dma.done.wait [#allocation3], 128  }
   0xc   :  { %75 = vsyncadd [#allocation3], 4294967168  ;;  %v23_v0 = vld [vmem:[#allocation2] sm:$0xff]  ;;  %vm32_vm0 = vcmask 261120   ;;  %vm41_vm1 = vcmask 7168  }
   0xd   :  { %v48_v1 = vld [vmem:[%s102_s1] ss:$0 sm:$0xff] }
   0xe   :  { %v31_v2 = vmul.f32 %v48_v1, %v23_v0 }
  0x10   :  { %v33_v3 = vsel %vm32_vm0, %v31_v2, 0.0 }
  0x11   :  { %34 = vadd.xlane.f32.xlu0 %v33_v3 }
  0x9a   :  { %v35_v4 = vpop.xlane.xlu0 %34 }
  0x9b   :  { %v36_v5 = vsub.f32 0.0, %v35_v4 }
  0x9d   :  { %v37_v6 = vmul.f32 1.442695, %v36_v5 }
  0x9f   :  { %50 = vpow2.f32 %v37_v6 }
  0xac   :  { %v51_v7 = vpop.eup %50 }
  0xad   :  { %v39_v8 = vadd.f32 1.0, %v51_v7 }
  0xaf   :  { %52 = vrcp.f32 %v39_v8 }
  0xbc   :  { %v53_v9 = vpop.eup %52 }
  0xbd   :  { %42 = vst.msk [vmem:[%s103_s2] sm:$0xff] %vm41_vm1, %v53_v9 }
  0xbe   :  { %47 = vsyncpa [#allocation3], 1 }

</bundles_post_ra>
